<compile_context>
chip_gen: v7x
topology: tpu7x:2x2x1
jax: 0.10.0
libtpu: 0.0.40
codegen_flags: <defaults>
</compile_context>

<pallas_src>
import jax
import jax.numpy as jnp
from jax.experimental import pallas as pl
from jax.experimental.pallas import tpu as pltpu

STATE_SIZE = 35
HIDDEN_SIZE = 128
HEAD_HIDDEN = 64
N_SPEED = 5
OUT_ROWS = 8  # packed output rows: [steer, speed_q[0:5], pad, pad]


def careful_dqn_kernel(
    x_ref,             # (35, TB)   bf16   (feature-major, batch on lanes)
    w1_ref, b1_ref,    # (128, 35)  bf16, (128, 1) f32
    w2_ref, b2_ref,    # (128, 128) bf16, (128, 1) f32
    wh1_ref, bh1_ref,  # fused head layer-1: (128, 128) bf16, (128, 1) f32
    wh2_ref, bh2_ref,  # fused block-diag head layer-2: (8, 128) bf16, (8, 1) f32
    out_ref,           # (8, TB)    f32   (row 0 = steering, rows 1:6 = speed Q)
):
    x = x_ref[...]  # already bf16

    # --- features trunk (Dropout(0.1) == identity in eval mode) ---
    h = jnp.dot(w1_ref[...], x, preferred_element_type=jnp.float32) + b1_ref[...]
    h = jnp.maximum(h, 0.0)
    h = jnp.dot(w2_ref[...], h.astype(jnp.bfloat16),
                preferred_element_type=jnp.float32) + b2_ref[...]
    h = jnp.maximum(h, 0.0)

    # --- fused head layer 1: rows 0:64 = steering hidden, rows 64:128 = speed hidden ---
    g = jnp.dot(wh1_ref[...], h.astype(jnp.bfloat16),
                preferred_element_type=jnp.float32) + bh1_ref[...]
    g = jnp.maximum(g, 0.0)

    # --- fused head layer 2 (block-diagonal): row 0 = steering logit, rows 1:6 = speed Q ---
    packed = jnp.dot(wh2_ref[...], g.astype(jnp.bfloat16),
                     preferred_element_type=jnp.float32) + bh2_ref[...]

    # tanh only on the steering row (EUP work, hidden under the MXU pushes)
    row = jax.lax.broadcasted_iota(jnp.int32, packed.shape, dimension=0)
    packed = jnp.where(row == 0, jnp.tanh(packed), packed)

    out_ref[...] = packed.astype(out_ref.dtype)


def _round_up(a, m):
    return ((a + m - 1) // m) * m


def _default_min_grid_steps():
    """v7x has 2 TensorCores per chip; keep >=2 grid steps so 'parallel' sharding engages."""
    try:
        kind = jax.devices()[0].device_kind.lower()
        if "v7" in kind:
            return 2
    except Exception:
        pass
    return 1


def pack_params(params):
    """Transpose to feature-major, fuse the two heads, cast matmul weights to bf16."""
    f32, bf16 = jnp.float32, jnp.bfloat16
    w1t = params["w1"].T.astype(bf16)                                   # (128, 35)
    b1 = params["b1"].reshape(-1, 1).astype(f32)                        # (128, 1)
    w2t = params["w2"].T.astype(bf16)                                   # (128, 128)
    b2 = params["b2"].reshape(-1, 1).astype(f32)                        # (128, 1)
    wh1t = jnp.concatenate([params["ws1"], params["wv1"]], axis=1).T.astype(bf16)  # (128, 128)
    bh1 = jnp.concatenate([params["bs1"], params["bv1"]], axis=1).reshape(-1, 1).astype(f32)
    # block-diagonal second layer: steering reads g[0:64], speed reads g[64:128]
    wh2t = jnp.zeros((OUT_ROWS, 2 * HEAD_HIDDEN), f32)
    wh2t = wh2t.at[0:1, :HEAD_HIDDEN].set(params["ws2"].T)              # steer row
    wh2t = wh2t.at[1:1 + N_SPEED, HEAD_HIDDEN:].set(params["wv2"].T)    # speed rows
    wh2t = wh2t.astype(bf16)
    bh2 = jnp.zeros((OUT_ROWS, 1), f32)
    bh2 = bh2.at[0:1, :].set(params["bs2"])
    bh2 = bh2.at[1:1 + N_SPEED, :].set(params["bv2"].T)
    return (w1t, b1, w2t, b2, wh1t, bh1, wh2t, bh2)


def careful_dqn_forward(x, params, *, block_batch=4096, min_grid_steps=None):
    """x: (B, 35) float32. Returns (steering (B, 1), speed_q (B, 5)) float32."""
    B, S = x.shape
    assert S == STATE_SIZE
    if min_grid_steps is None:
        min_grid_steps = _default_min_grid_steps()
    packed_params = pack_params(params)

    # Batch is the lane axis, so the per-tile batch TB must be a multiple of 128.  Use the
    # largest tile that fits block_batch while still giving >= min_grid_steps grid steps.
    TB = min(_round_up(block_batch, 128),
             _round_up(pl.cdiv(B, max(min_grid_steps, 1)), 128))
    Bp = _round_up(B, TB)
    grid = (Bp // TB,)

    # Stream x as bf16, feature-major (lane-dense: last dim = batch), zero-padded batch cols.
    x_t = jnp.pad(x.astype(jnp.bfloat16).T, ((0, 0), (0, Bp - B)))

    def batch_map(i):
        return (0, i)

    def const_map(i):
        return (0, 0)

    in_specs = [pl.BlockSpec((STATE_SIZE, TB), batch_map)]
    in_specs += [pl.BlockSpec(p.shape, const_map) for p in packed_params]
    out_spec = pl.BlockSpec((OUT_ROWS, TB), batch_map)

    flops_per_row = 2 * (STATE_SIZE * HIDDEN_SIZE + HIDDEN_SIZE * HIDDEN_SIZE
                         + HIDDEN_SIZE * HIDDEN_SIZE + HIDDEN_SIZE * OUT_ROWS)
    weight_bytes = sum(int(p.size) * p.dtype.itemsize for p in packed_params)
    cost = pl.CostEstimate(
        flops=Bp * flops_per_row,
        transcendentals=Bp * OUT_ROWS,
        bytes_accessed=Bp * (STATE_SIZE * 2 + OUT_ROWS * 4) + weight_bytes,
    )

    packed_out = pl.pallas_call(
        careful_dqn_kernel,
        out_shape=jax.ShapeDtypeStruct((OUT_ROWS, Bp), jnp.float32),
        grid=grid,
        in_specs=in_specs,
        out_specs=out_spec,
        compiler_params=pltpu.CompilerParams(
            dimension_semantics=("parallel",),
        ),
        cost_estimate=cost,
    )(x_t, *packed_params)

    steering = packed_out[0:1, :B].T               # (B, 1)
    speed_q = packed_out[1:1 + N_SPEED, :B].T      # (B, 5)
    return steering, speed_q


def init_params(key, state_size=STATE_SIZE, hidden_size=HIDDEN_SIZE):
    """Deterministic synthetic parameters matching CarefulDQN's layer shapes, stored as (in, out)."""
    shapes = {
        "w1": (state_size, hidden_size), "b1": (1, hidden_size),
        "w2": (hidden_size, hidden_size), "b2": (1, hidden_size),
        "ws1": (hidden_size, HEAD_HIDDEN), "bs1": (1, HEAD_HIDDEN),
        "ws2": (HEAD_HIDDEN, 1), "bs2": (1, 1),
        "wv1": (hidden_size, HEAD_HIDDEN), "bv1": (1, HEAD_HIDDEN),
        "wv2": (HEAD_HIDDEN, N_SPEED), "bv2": (1, N_SPEED),
    }
    params = {}
    keys = jax.random.split(key, len(shapes))
    for k_rng, (name, shape) in zip(keys, shapes.items()):
        fan_in = shape[0] if name.startswith("w") else shape[1]
        scale = 1.0 / jnp.sqrt(jnp.float32(fan_in))
        params[name] = scale * jax.random.normal(k_rng, shape, dtype=jnp.float32)
    return params


def reference_forward(x, p):
    """Plain-JAX reference with matching bf16-matmul / f32-accumulate numerics."""
    def mm(a, w):
        return jnp.dot(a.astype(jnp.bfloat16), w.astype(jnp.bfloat16),
                       preferred_element_type=jnp.float32)
    h = jnp.maximum(mm(x, p["w1"]) + p["b1"], 0.0)
    h = jnp.maximum(mm(h, p["w2"]) + p["b2"], 0.0)
    s = jnp.maximum(mm(h, p["ws1"]) + p["bs1"], 0.0)
    steer = jnp.tanh(mm(s, p["ws2"]) + p["bs2"])
    v = jnp.maximum(mm(h, p["wv1"]) + p["bv1"], 0.0)
    speed = mm(v, p["wv2"]) + p["bv2"]
    return steer, speed


if __name__ == "__main__":
    key = jax.random.PRNGKey(0)
    k_params, k_x = jax.random.split(key)

    batch = 300  # not a multiple of the 128-lane tile -> exercises padding + multi-step grid
    params = init_params(k_params)
    x = jax.random.normal(k_x, (batch, STATE_SIZE), dtype=jnp.float32)

    # Small block_batch so this tiny test actually takes several grid steps; production use
    # keeps the default block_batch=4096 (one or two big tiles, 2 on v7x for megacore).
    steering, speed_q = careful_dqn_forward(x, params, block_batch=128)
    steering = jax.block_until_ready(steering)
    speed_q = jax.block_until_ready(speed_q)

    ref_steer, ref_speed = reference_forward(x, params)
    assert steering.shape == (batch, 1)
    assert speed_q.shape == (batch, N_SPEED)
    assert jnp.allclose(steering, ref_steer, atol=2e-3, rtol=2e-3), \
        float(jnp.max(jnp.abs(steering - ref_steer)))
    assert jnp.allclose(speed_q, ref_speed, atol=2e-3, rtol=2e-3), \
        float(jnp.max(jnp.abs(speed_q - ref_speed)))

    print("KERNEL_OK")
</pallas_src>

<mosaic_0001>
module attributes {stable_mosaic.version = 11 : i64} {
  func.func @careful_dqn_kernel(%arg0: i32, %arg1: memref<35x128xbf16, #tpu.memory_space<vmem>>, %arg2: memref<128x35xbf16, #tpu.memory_space<vmem>>, %arg3: memref<128x1xf32, #tpu.memory_space<vmem>>, %arg4: memref<128x128xbf16, #tpu.memory_space<vmem>>, %arg5: memref<128x1xf32, #tpu.memory_space<vmem>>, %arg6: memref<128x128xbf16, #tpu.memory_space<vmem>>, %arg7: memref<128x1xf32, #tpu.memory_space<vmem>>, %arg8: memref<8x128xbf16, #tpu.memory_space<vmem>>, %arg9: memref<8x1xf32, #tpu.memory_space<vmem>>, %arg10: memref<8x128xf32, #tpu.memory_space<vmem>>) attributes {dimension_semantics = [#tpu.dimension_semantics<parallel>], iteration_bounds = array<i64: 3>, scalar_prefetch = 0 : i64, scratch_operands = 0 : i64, tpu.core_type = #tpu.core_type<tc>, window_params = [{transform_indices = @transform_0, window_bounds = array<i64: 35, 128>}, {pipeline_mode = #tpu.pipeline_mode<synchronous>, transform_indices = @transform_1, window_bounds = array<i64: 128, 35>}, {pipeline_mode = #tpu.pipeline_mode<synchronous>, transform_indices = @transform_2, window_bounds = array<i64: 128, 1>}, {pipeline_mode = #tpu.pipeline_mode<synchronous>, transform_indices = @transform_3, window_bounds = array<i64: 128, 128>}, {pipeline_mode = #tpu.pipeline_mode<synchronous>, transform_indices = @transform_4, window_bounds = array<i64: 128, 1>}, {pipeline_mode = #tpu.pipeline_mode<synchronous>, transform_indices = @transform_5, window_bounds = array<i64: 128, 128>}, {pipeline_mode = #tpu.pipeline_mode<synchronous>, transform_indices = @transform_6, window_bounds = array<i64: 128, 1>}, {pipeline_mode = #tpu.pipeline_mode<synchronous>, transform_indices = @transform_7, window_bounds = array<i64: 8, 128>}, {pipeline_mode = #tpu.pipeline_mode<synchronous>, transform_indices = @transform_8, window_bounds = array<i64: 8, 1>}, {transform_indices = @transform_9, window_bounds = array<i64: 8, 128>}]} {
    %c0 = arith.constant 0 : index
    %c0_0 = arith.constant 0 : index
    %0 = vector.load %arg1[%c0, %c0_0] : memref<35x128xbf16, #tpu.memory_space<vmem>>, vector<35x128xbf16>
    %c0_1 = arith.constant 0 : index
    %c0_2 = arith.constant 0 : index
    %1 = vector.load %arg2[%c0_1, %c0_2] : memref<128x35xbf16, #tpu.memory_space<vmem>>, vector<128x35xbf16>
    %cst = arith.constant dense<0.000000e+00> : vector<128x128xf32>
    %2 = tpu.matmul %1, %0, %cst {dimension_numbers = #tpu.dot_dimension_numbers<[1], [0], [0], [1], [0, 0, 1, 1], [], []>} : vector<128x35xbf16>, vector<35x128xbf16>, vector<128x128xf32> -> vector<128x128xf32>
    %c0_3 = arith.constant 0 : index
    %c0_4 = arith.constant 0 : index
    %3 = vector.load %arg3[%c0_3, %c0_4] : memref<128x1xf32, #tpu.memory_space<vmem>>, vector<128x1xf32>
    %4 = vector.broadcast %3 : vector<128x1xf32> to vector<128x128xf32>
    %5 = arith.addf %2, %4 : vector<128x128xf32>
    %cst_5 = arith.constant 0.000000e+00 : f32
    %6 = vector.broadcast %cst_5 : f32 to vector<128x128xf32>
    %7 = arith.maximumf %5, %6 : vector<128x128xf32>
    %c0_6 = arith.constant 0 : index
    %c0_7 = arith.constant 0 : index
    %8 = vector.load %arg4[%c0_6, %c0_7] : memref<128x128xbf16, #tpu.memory_space<vmem>>, vector<128x128xbf16>
    %9 = arith.truncf %7 : vector<128x128xf32> to vector<128x128xbf16>
    %cst_8 = arith.constant dense<0.000000e+00> : vector<128x128xf32>
    %10 = tpu.matmul %8, %9, %cst_8 {dimension_numbers = #tpu.dot_dimension_numbers<[1], [0], [0], [1], [0, 0, 1, 1], [], []>} : vector<128x128xbf16>, vector<128x128xbf16>, vector<128x128xf32> -> vector<128x128xf32>
    %c0_9 = arith.constant 0 : index
    %c0_10 = arith.constant 0 : index
    %11 = vector.load %arg5[%c0_9, %c0_10] : memref<128x1xf32, #tpu.memory_space<vmem>>, vector<128x1xf32>
    %12 = vector.broadcast %11 : vector<128x1xf32> to vector<128x128xf32>
    %13 = arith.addf %10, %12 : vector<128x128xf32>
    %cst_11 = arith.constant 0.000000e+00 : f32
    %14 = vector.broadcast %cst_11 : f32 to vector<128x128xf32>
    %15 = arith.maximumf %13, %14 : vector<128x128xf32>
    %c0_12 = arith.constant 0 : index
    %c0_13 = arith.constant 0 : index
    %16 = vector.load %arg6[%c0_12, %c0_13] : memref<128x128xbf16, #tpu.memory_space<vmem>>, vector<128x128xbf16>
    %17 = arith.truncf %15 : vector<128x128xf32> to vector<128x128xbf16>
    %cst_14 = arith.constant dense<0.000000e+00> : vector<128x128xf32>
    %18 = tpu.matmul %16, %17, %cst_14 {dimension_numbers = #tpu.dot_dimension_numbers<[1], [0], [0], [1], [0, 0, 1, 1], [], []>} : vector<128x128xbf16>, vector<128x128xbf16>, vector<128x128xf32> -> vector<128x128xf32>
    %c0_15 = arith.constant 0 : index
    %c0_16 = arith.constant 0 : index
    %19 = vector.load %arg7[%c0_15, %c0_16] : memref<128x1xf32, #tpu.memory_space<vmem>>, vector<128x1xf32>
    %20 = vector.broadcast %19 : vector<128x1xf32> to vector<128x128xf32>
    %21 = arith.addf %18, %20 : vector<128x128xf32>
    %cst_17 = arith.constant 0.000000e+00 : f32
    %22 = vector.broadcast %cst_17 : f32 to vector<128x128xf32>
    %23 = arith.maximumf %21, %22 : vector<128x128xf32>
    %c0_18 = arith.constant 0 : index
    %c0_19 = arith.constant 0 : index
    %24 = vector.load %arg8[%c0_18, %c0_19] : memref<8x128xbf16, #tpu.memory_space<vmem>>, vector<8x128xbf16>
    %25 = arith.truncf %23 : vector<128x128xf32> to vector<128x128xbf16>
    %cst_20 = arith.constant dense<0.000000e+00> : vector<8x128xf32>
    %26 = tpu.matmul %24, %25, %cst_20 {dimension_numbers = #tpu.dot_dimension_numbers<[1], [0], [0], [1], [0, 0, 1, 1], [], []>} : vector<8x128xbf16>, vector<128x128xbf16>, vector<8x128xf32> -> vector<8x128xf32>
    %c0_21 = arith.constant 0 : index
    %c0_22 = arith.constant 0 : index
    %27 = vector.load %arg9[%c0_21, %c0_22] : memref<8x1xf32, #tpu.memory_space<vmem>>, vector<8x1xf32>
    %28 = vector.broadcast %27 : vector<8x1xf32> to vector<8x128xf32>
    %29 = arith.addf %26, %28 : vector<8x128xf32>
    %30 = tpu.iota {dimensions = array<i32: 0>} : vector<8x128xi32>
    %c0_i32 = arith.constant 0 : i32
    %31 = vector.broadcast %c0_i32 : i32 to vector<8x128xi32>
    %32 = arith.cmpi eq, %30, %31 : vector<8x128xi32>
    %33 = math.tanh %29 : vector<8x128xf32>
    %34 = arith.select %32, %33, %29 : vector<8x128xi1>, vector<8x128xf32>
    %c0_23 = arith.constant 0 : index
    %c0_24 = arith.constant 0 : index
    %35 = vector.load %arg10[%c0_23, %c0_24] : memref<8x128xf32, #tpu.memory_space<vmem>>, vector<8x128xf32>
    tpu.vector_store %arg10[%c0_23, %c0_24], %34 {strides = array<i32>} : memref<8x128xf32, #tpu.memory_space<vmem>>, vector<8x128xf32>,
    return
  }
  func.func @transform_0(%arg0: i32) -> (i32, i32) {
    %c0_i32 = arith.constant 0 : i32
    %c0_i32_0 = arith.constant 0 : i32
    return %c0_i32, %arg0 : i32, i32
  }
  func.func @transform_1(%arg0: i32) -> (i32, i32) {
    %c0_i32 = arith.constant 0 : i32
    %c0_i32_0 = arith.constant 0 : i32
    %c0_i32_1 = arith.constant 0 : i32
    return %c0_i32, %c0_i32_0 : i32, i32
  }
  func.func @transform_2(%arg0: i32) -> (i32, i32) {
    %c0_i32 = arith.constant 0 : i32
    %c0_i32_0 = arith.constant 0 : i32
    %c0_i32_1 = arith.constant 0 : i32
    return %c0_i32, %c0_i32_0 : i32, i32
  }
  func.func @transform_3(%arg0: i32) -> (i32, i32) {
    %c0_i32 = arith.constant 0 : i32
    %c0_i32_0 = arith.constant 0 : i32
    %c0_i32_1 = arith.constant 0 : i32
    return %c0_i32, %c0_i32_0 : i32, i32
  }
  func.func @transform_4(%arg0: i32) -> (i32, i32) {
    %c0_i32 = arith.constant 0 : i32
    %c0_i32_0 = arith.constant 0 : i32
    %c0_i32_1 = arith.constant 0 : i32
    return %c0_i32, %c0_i32_0 : i32, i32
  }
  func.func @transform_5(%arg0: i32) -> (i32, i32) {
    %c0_i32 = arith.constant 0 : i32
    %c0_i32_0 = arith.constant 0 : i32
    %c0_i32_1 = arith.constant 0 : i32
    return %c0_i32, %c0_i32_0 : i32, i32
  }
  func.func @transform_6(%arg0: i32) -> (i32, i32) {
    %c0_i32 = arith.constant 0 : i32
    %c0_i32_0 = arith.constant 0 : i32
    %c0_i32_1 = arith.constant 0 : i32
    return %c0_i32, %c0_i32_0 : i32, i32
  }
  func.func @transform_7(%arg0: i32) -> (i32, i32) {
    %c0_i32 = arith.constant 0 : i32
    %c0_i32_0 = arith.constant 0 : i32
    %c0_i32_1 = arith.constant 0 : i32
    return %c0_i32, %c0_i32_0 : i32, i32
  }
  func.func @transform_8(%arg0: i32) -> (i32, i32) {
    %c0_i32 = arith.constant 0 : i32
    %c0_i32_0 = arith.constant 0 : i32
    %c0_i32_1 = arith.constant 0 : i32
    return %c0_i32, %c0_i32_0 : i32, i32
  }
  func.func @transform_9(%arg0: i32) -> (i32, i32) {
    %c0_i32 = arith.constant 0 : i32
    %c0_i32_0 = arith.constant 0 : i32
    return %c0_i32, %arg0 : i32, i32
  }
}

</mosaic_0001>

<bundles_post_ra>
// kernel: tpu_custom_call.1
= control target key start
LH: loop header
LB: loop body
LE: loop exit
PB: predicated region body
PF: predicated region fallthrough
CT: control target
= control target key end

     0   :  { %14 = vsyncpa [#allocation4], 0  ;;  %s2152_s0 = inlined_call_operand.vmem [shape: bf16[35,384], index: 0, kind: input, shape index: {}]   ;;  %s2153_s1 = inlined_call_operand.vmem [shape: bf16[128,35], index: 1, kind: input, shape index: {}]   ;;  %s2154_s2 = inlined_call_operand.vmem [shape: f32[128,1], index: 2, kind: input, shape index: {}]   ;;  %s2155_s3 = inlined_call_operand.vmem [shape: bf16[128,128], index: 3, kind: input, shape index: {}]   ;;  %s2156_s4 = inlined_call_operand.vmem [shape: f32[128,1], index: 4, kind: input, shape index: {}]   ;;  %s2157_s5 = inlined_call_operand.vmem [shape: bf16[128,128], index: 5, kind: input, shape index: {}]   ;;  %s2158_s6 = inlined_call_operand.vmem [shape: f32[128,1], index: 6, kind: input, shape index: {}]   ;;  %s2159_s7 = inlined_call_operand.vmem [shape: bf16[8,128], index: 7, kind: input, shape index: {}]   ;;  %s2160_s8 = inlined_call_operand.vmem [shape: f32[8,1], index: 8, kind: input, shape index: {}]   ;;  %s2161_s9 = inlined_call_operand.hbm [shape: f32[8,384], index: 9, kind: output, shape index: {}]  }
   0x1   :  { %16 = vsyncpa [#allocation4 + $0x1], 0  ;;  %s1806_s30 = smov 0   ;;  %s1808_s10 = smov 0  }
   0x2   :  { %s1810_s11 = smov 0   ;;  %s1812_s12 = smov 0  }
   0x3 LB: > { %s1407_s13 = sadd.s32 4294967295, %s1749_s12   ;;  %s1408_s14 = sadd.s32 4294967294, %s1749_s12   ;;  %s1749_s12 = sphi %s1812_s12, %s2167_s12   ;;  %s1745_s11 = sphi %s1810_s11, %s2166_s11   ;;  %s1741_s10 = sphi %s1808_s10, %s2165_s10   ;;  %s1737_s30 = sphi %s1806_s30, %s2164_s30  }
   0x4   : > { %s1829_s15 = sadd.s32 1, %s1749_s12   ;;  %s29_s16 = sadd.s32 1, %s1745_s11 }
   0x5   : > { %s26_s17 = ssub.s32 %s1749_s12, %s1829_s15  ;;  %p36_p0 = scmp.ne.s32.totalorder %s1745_s11, %s1741_s10 }
   0x6   : > { %p27_p1 = scmp.eq.s32.totalorder %s26_s17, 0  ;;  %p37_p2 = scmp.eq.s32.totalorder %s1749_s12, 0 }
   0x7   : > { %p234_p3 = scmp.eq.s32.totalorder %s1407_s13, 2  ;;  %p239_p4 = scmp.ne.s32.totalorder %s1741_s10, %s1737_s30 }
   0x8   : > { %s1842_s18 = scalar_select %p27_p1, %s1745_s11, %s29_s16  }
   0x9   : > { %p38_p5 = por %p37_p2, %p36_p0  ;;  %p1844_p6 = por %p234_p3, %p36_p0 }
   0xa   : > { %p240_p7 = scmp.eq.s32.totalorder %s1408_s14, 2  ;;  %p1410_p9 = scmp.ge.s32.totalorder %s1749_s12, 3 }
   0xc   : > { %p1848_p8 = por %p240_p7, %p239_p4  ;;  %280 = sbr.rel (%p1410_p9) target bundleno = 27 (0x1b), region = 48 }
  0x13   : > { %283 = sbr.rel (!%p38_p5) target bundleno = 27 (0x1b), region = 52  ;;  %s285_s21 = sand.u32 (%p38_p5), 1, %s1745_s11  }
  0x14   : > { %s1411_s22 = sshll.u32 (%p38_p5), %s1749_s12, 2  ;;  %s1611_s23 = smul.u32 (%p38_p5), 20, %s285_s21 }
  0x15   : > { %s289_s26 = scalar_lea.vmem (%p38_p5), %s2152_s0, %s1411_s22 }
  0x16   : > { %v305_v0 = vld [vmem:[%s289_s26] sm:$0xf] (%p38_p5)  ;;  %v307_v1 = vld [vmem:[%s289_s26 + $0xc] sm:$0xf] (%p38_p5)  ;;  %v309_v2 = vld [vmem:[%s289_s26 + $0x18] sm:$0xf] (%p38_p5) }
  0x17   : > { %v311_v3 = vld [vmem:[%s289_s26 + $0x24] sm:$0xf] (%p38_p5)  ;;  %v313_v4 = vld [vmem:[%s289_s26 + $0x30] sm:$0xf] (%p38_p5)  ;;  %s287_s27 = scalar_lea.vmem (%p38_p5), [#allocation2], %s1611_s23 }
  0x18   : > { %306 = vst [vmem:[%s287_s27] sm:$0xf] (%p38_p5), %v305_v0  ;;  %308 = vst [vmem:[%s287_s27 + $0x4] sm:$0xf] (%p38_p5), %v307_v1 }
  0x19   : > { %310 = vst [vmem:[%s287_s27 + $0x8] sm:$0xf] (%p38_p5), %v309_v2  ;;  %312 = vst [vmem:[%s287_s27 + $0xc] sm:$0xf] (%p38_p5), %v311_v3 }
  0x1a   : > { %314 = vst [vmem:[%s287_s27 + $0x10] sm:$0xf] %v313_v4 }
  0x1b PF: > { %p1412_p10 = scmp.ge.s32.totalorder %s1749_s12, 1  ;;  %p346_p11 = scmp.lt.s32.totalorder %s1749_s12, 4 }
  0x1d   : > { %p347_p12 = pnand %p1412_p10, %p346_p11 }
  0x1e   : > { %v410_v5 = vld [vmem:[%s2154_s2] sm:$0xff] (!%p347_p12)  ;;  %s1864_s14 = sand.u32 (!%p347_p12), 1, %s1741_s10   ;;  %v412_v6 = vld [vmem:[%s2154_s2 + $0x10] sm:$0xff] (!%p347_p12)  ;;  %vm586_vm0 = vcmask (!%p347_p12), 1040384   ;;  %v1751_v7 = vmov (!%p347_p12), 0   ;;  %vm587_vm1 = vcmask (!%p347_p12), 1041408  }
  0x1f   : > { %350 = sbr.rel (%p347_p12) target bundleno = 1046 (0x416), region = 93  ;;  %1656 = vset.pattern.permute.xlu0 (!%p347_p12), %v1751_v7  ;;  %1657 = vset.pattern.permute.xlu1 (!%p347_p12), %v1751_v7  ;;  %v1752_v8 = vmov (!%p347_p12), 65535   ;;  %v1661_v10 = vld [vmem:[%s2153_s1] sm:$0xff] (!%p347_p12)   ;;  %v411_v11 = vld [vmem:[%s2154_s2 + $0x8] sm:$0xff] (!%p347_p12)  ;;  %v413_v12 = vld [vmem:[%s2154_s2 + $0x18] sm:$0xff] (!%p347_p12)  ;;  %vm561_vm2 = vcmask (!%p347_p12), 285696  }
  0x20   : > { %s1612_s21 = smul.u32 (!%p347_p12), 20, %s1864_s14  ;;  %428 = vperm.xlu0 (!%p347_p12), %1656, %v410_v5   ;;  %438 = vperm.xlu1 (!%p347_p12), %1657, %v412_v6   ;;  %v588_v9 = vsel (!%p347_p12), %vm586_vm0, 4294967295, %v1752_v8  ;;  %v414_v17 = vld [vmem:[%s2154_s2 + $0x20] sm:$0xff] (!%p347_p12)  ;;  %v415_v19 = vld [vmem:[%s2154_s2 + $0x28] sm:$0xff] (!%p347_p12)  ;;  %v416_v20 = vld [vmem:[%s2154_s2 + $0x30] sm:$0xff] (!%p347_p12)  ;;  %vm1754_vm3 = vmmov (!%p347_p12), 0  }
  0x21   : > { %1511 = vmatprep.mubr.msk.bf16.mxu0 (!%p347_p12), %vm561_vm2, %v1661_v10  ;;  %v589_v15 = vsel (!%p347_p12), %vm587_vm1, %v588_v9, 0  ;;  %v417_v21 = vld [vmem:[%s2154_s2 + $0x38] sm:$0xff] (!%p347_p12)  ;;  %v1662_v22 = vld [vmem:[%s2153_s1 + $0x8] sm:$0xff] (!%p347_p12)   ;;  %v418_v23 = vld [vmem:[%s2154_s2 + $0x40] sm:$0xff] (!%p347_p12)  ;;  %s1413_s24 = sshll.u32 (!%p347_p12), %s1864_s14, 3  ;;  %s1450_s25 = sshll.u32 (!%p347_p12), %s1407_s13, 7 }
  0x22   : > { %s355_s28 = scalar_lea.vmem (!%p347_p12), [#allocation2], %s1612_s21  ;;  %v1663_v24 = vld [vmem:[%s2153_s1 + $0x10] sm:$0xff] (!%p347_p12)   ;;  %v419_v25 = vld [vmem:[%s2154_s2 + $0x48] sm:$0xff] (!%p347_p12)  ;;  %v421_v27 = vld [vmem:[%s2154_s2 + $0x58] sm:$0xff] (!%p347_p12)  ;;  %s387_s26 = scalar_lea.vmem (!%p347_p12), [#allocation3], %s1413_s24 }
  0x23   : > { %v1658_v13 = vld [vmem:[%s355_s28] sm:$0xff] (!%p347_p12)   ;;  %v1659_v14 = vld [vmem:[%s355_s28 + $0x8] sm:$0xff] (!%p347_p12)   ;;  %v1660_v16 = vld [vmem:[%s355_s28 + $0x10] ss:$0 sps:$4 sm:$0x33] (!%p347_p12)   ;;  %s1343_s27 = sshll.u32 (!%p347_p12), %s387_s26, 4  ;;  %s2109_s16 = scalar_lea.hbm (!%p347_p12), %s2161_s9, %s1450_s25  ;;  %s2111_s27 = int_to_ptr.vmem [resolvable:$true] %s1343_s27 }
  0x24   : > { %1505 = vmatprep.subr.bf16.mxu0 (!%p347_p12), %v1658_v13  ;;  %433 = vperm.xlu0 (!%p347_p12), %1656, %v411_v11   ;;  %v591_v18 = vand.u32 (!%p347_p12), %v1660_v16, %v589_v15  ;;  %v420_v26 = vld [vmem:[%s2154_s2 + $0x50] sm:$0xff] (!%p347_p12)  ;;  %v1664_v28 = vld [vmem:[%s2153_s1 + $0x18] sm:$0xff] (!%p347_p12)   ;;  %v422_v29 = vld [vmem:[%s2154_s2 + $0x60] sm:$0xff] (!%p347_p12)  ;;  %s1330_s17 = scalar_lea.sflag (!%p347_p12), [#allocation4], %s1864_s14  ;;  %s1687_s22 = scalar_lea.vmem (!%p347_p12), %s2111_s27, 128 }
  0x25   : > { %1506 = vmatpush3.bf16.msra.mxu0 (!%p347_p12), %v1658_v13  ;;  %443 = vperm.xlu1 (!%p347_p12), %1657, %v413_v12   ;;  %v1665_v30 = vld [vmem:[%s2153_s1 + $0x20] sm:$0xff] (!%p347_p12)   ;;  %v423_v31 = vld [vmem:[%s2154_s2 + $0x68] sm:$0xff] (!%p347_p12)  ;;  %v424_v32 = vld [vmem:[%s2154_s2 + $0x70] sm:$0xff] (!%p347_p12)  ;;  %p1688_p13 = scmp.ne.s32.totalorder (!%p347_p12), %s2111_s27, %s1687_s22  ;;  %s1755_s13 = smov (!%p347_p12), [#allocation3]  }
  0x26   : > { %1507 = vmatprep.subr.bf16.mxu0 %v1659_v14  ;;  %v425_v33 = vld [vmem:[%s2154_s2 + $0x78] sm:$0xff]  ;;  %v1666_v34 = vld [vmem:[%s2153_s1 + $0x28] sm:$0xff]   ;;  %v730_v35 = vld [vmem:[%s2156_s4] sm:$0xff]  ;;  %s1691_s21 = sshll.u32 %s1755_s13, 4  ;;  %s1692_s21 = int_to_ptr.vmem [resolvable:$false] %s1691_s21 }
  0x27   : > { %v1667_v36 = vld [vmem:[%s2153_s1 + $0x30] sm:$0xff]   ;;  %v731_v37 = vld [vmem:[%s2156_s4 + $0x8] sm:$0xff]  ;;  %v733_v39 = vld [vmem:[%s2156_s4 + $0x18] sm:$0xff]  ;;  %p1689_p0 = pnand %p1688_p13, %p1844_p6  ;;  %s1693_s23 = scalar_lea.vmem %s1692_s21, 256 }
  0x28   : > { %448 = vperm.xlu0 %1656, %v414_v17   ;;  %v732_v38 = vld [vmem:[%s2156_s4 + $0x10] sm:$0xff]  ;;  %v1668_v40 = vld [vmem:[%s2153_s1 + $0x38] sm:$0xff]   ;;  %v734_v41 = vld [vmem:[%s2156_s4 + $0x20] sm:$0xff]  ;;  %p1694_p2 = scmp.lt.s32.totalorder %s2111_s27, %s1692_s21  ;;  %p1695_p3 = scmp.lt.s32.totalorder %s1693_s23, %s1687_s22 }
  0x29   : > { %1508 = vmatpush3.bf16.msra.mxu0 %v1659_v14  ;;  %453 = vperm.xlu1 %1657, %v415_v19   ;;  %v735_v42 = vld [vmem:[%s2156_s4 + $0x28] sm:$0xff]  ;;  %v736_v43 = vld [vmem:[%s2156_s4 + $0x30] sm:$0xff]  ;;  %v737_v44 = vld [vmem:[%s2156_s4 + $0x38] sm:$0xff]  ;;  %p1690_p1 = pneg %p1689_p0 }
  0x2a   : > { %1509 = vmatprep.subr.bf16.mxu0 %v591_v18  ;;  %v738_v45 = vld [vmem:[%s2156_s4 + $0x40] sm:$0xff]  ;;  %v739_v46 = vld [vmem:[%s2156_s4 + $0x48] sm:$0xff]  ;;  %v740_v47 = vld [vmem:[%s2156_s4 + $0x50] sm:$0xff]  ;;  %p1696_p4 = por %p1695_p3, %p1694_p2 }
  0x2b   : > { %v741_v48 = vld [vmem:[%s2156_s4 + $0x58] sm:$0xff]  ;;  %v742_v49 = vld [vmem:[%s2156_s4 + $0x60] sm:$0xff]  ;;  %v743_v50 = vld [vmem:[%s2156_s4 + $0x68] sm:$0xff] }
  0x2c   : > { %458 = vperm.xlu0 %1656, %v416_v20   ;;  %v744_v51 = vld [vmem:[%s2156_s4 + $0x70] sm:$0xff]  ;;  %v745_v52 = vld [vmem:[%s2156_s4 + $0x78] sm:$0xff]  ;;  %v1011_v53 = vld [vmem:[%s2158_s6] sm:$0xff]  ;;  %p1697_p5 = pnand %p1696_p4, %p1690_p1 }
  0x2d   : > { %1510 = vmatpush3.bf16.msra.mxu0 %v591_v18  ;;  %463 = vperm.xlu1 %1657, %v417_v21   ;;  %v1012_v54 = vld [vmem:[%s2158_s6 + $0x8] sm:$0xff]  ;;  %v1013_v55 = vld [vmem:[%s2158_s6 + $0x10] sm:$0xff]  ;;  %v1014_v56 = vld [vmem:[%s2158_s6 + $0x18] sm:$0xff] }
  0x2e   : > { %v1015_v57 = vld [vmem:[%s2158_s6 + $0x20] sm:$0xff]  ;;  %v1016_v58 = vld [vmem:[%s2158_s6 + $0x28] sm:$0xff]  ;;  %v1017_v59 = vld [vmem:[%s2158_s6 + $0x30] sm:$0xff] }
  0x2f   : > { %v1018_v60 = vld [vmem:[%s2158_s6 + $0x38] sm:$0xff]  ;;  %v1019_v61 = vld [vmem:[%s2158_s6 + $0x40] sm:$0xff]  ;;  %v1020_v62 = vld [vmem:[%s2158_s6 + $0x48] sm:$0xff] }
  0x30   : > { %1512 = vmatmul.mubr.msk.bf16.vlgmr.msra.gmra.mrb[0].mxu0 %vm561_vm2, %v1662_v22  ;;  %468 = vperm.xlu0 %1656, %v418_v23   ;;  %v1021_v63 = vld [vmem:[%s2158_s6 + $0x50] sm:$0xff]  ;;  %v1022_v0 = vld [vmem:[%s2158_s6 + $0x58] sm:$0xff]  ;;  %v1023_v1 = vld [vmem:[%s2158_s6 + $0x60] sm:$0xff] }
  0x31   : > { %1515 = vmatprep.mubr.msk.bf16.mxu0 %vm561_vm2, %v1663_v24  ;;  %473 = vperm.xlu1 %1657, %v419_v25   ;;  %v1024_v2 = vld [vmem:[%s2158_s6 + $0x68] sm:$0xff]  ;;  %v1025_v3 = vld [vmem:[%s2158_s6 + $0x70] sm:$0xff]  ;;  %v1026_v4 = vld [vmem:[%s2158_s6 + $0x78] sm:$0xff] }
  0x32   : > { %v1277_v5 = vld [vmem:[%s2160_s8] sm:$0xff] }
  0x33   : > { %v1669_v6 = vld [vmem:[%s2155_s3] sm:$0xff]  }
  0x34   : > { %478 = vperm.xlu0 %1656, %v420_v26   ;;  %1543 = vmatprep.mubr.bf16.mxu1 %v1669_v6 }
  0x35   : > { %483 = vperm.xlu1 %1657, %v421_v27  }
  0x38   : > { %1516 = vmatmul.mubr.msk.bf16.gmra.mrb[4].mxu0 %vm561_vm2, %v1664_v28  ;;  %488 = vperm.xlu0 %1656, %v422_v29  }
  0x39   : > { %1519 = vmatprep.mubr.msk.bf16.mxu0 %vm561_vm2, %v1665_v30  ;;  %493 = vperm.xlu1 %1657, %v423_v31  }
  0x3c   : > { %498 = vperm.xlu0 %1656, %v424_v32  }
  0x3d   : > { %503 = vperm.xlu1 %1657, %v425_v33  }
  0x40   : > { %1520 = vmatmul.mubr.msk.bf16.gmra.mrb[8].mxu0 %vm561_vm2, %v1666_v34  ;;  %748 = vperm.xlu0 %1656, %v730_v35  }
  0x41   : > { %1523 = vmatprep.mubr.msk.bf16.mxu0 %vm561_vm2, %v1667_v36  ;;  %753 = vperm.xlu1 %1657, %v731_v37  }
  0x44   : > { %758 = vperm.xlu0 %1656, %v732_v38  }
  0x45   : > { %763 = vperm.xlu1 %1657, %v733_v39  }
  0x48   : > { %1524 = vmatmul.mubr.msk.bf16.gmra.mrb[12].mxu0 %vm561_vm2, %v1668_v40  ;;  %768 = vperm.xlu0 %1656, %v734_v41  }
  0x49   : > { %773 = vperm.xlu1 %1657, %v735_v42  }
  0x4c   : > { %778 = vperm.xlu0 %1656, %v736_v43  }
  0x4d   : > { %783 = vperm.xlu1 %1657, %v737_v44  }
  0x50   : > { %788 = vperm.xlu0 %1656, %v738_v45  }
  0x51   : > { %793 = vperm.xlu1 %1657, %v739_v46  }
  0x54   : > { %798 = vperm.xlu0 %1656, %v740_v47  }
  0x55   : > { %803 = vperm.xlu1 %1657, %v741_v48  }
  0x58   : > { %808 = vperm.xlu0 %1656, %v742_v49  }
  0x59   : > { %813 = vperm.xlu1 %1657, %v743_v50  }
  0x5c   : > { %818 = vperm.xlu0 %1656, %v744_v51  }
  0x5d   : > { %823 = vperm.xlu1 %1657, %v745_v52  }
  0x60   : > { %1029 = vperm.xlu0 %1656, %v1011_v53  }
  0x61   : > { %1034 = vperm.xlu1 %1657, %v1012_v54  }
  0x64   : > { %1039 = vperm.xlu0 %1656, %v1013_v55  }
  0x65   : > { %1044 = vperm.xlu1 %1657, %v1014_v56  }
  0x68   : > { %1049 = vperm.xlu0 %1656, %v1015_v57  }
  0x69   : > { %1054 = vperm.xlu1 %1657, %v1016_v58  }
  0x6c   : > { %1059 = vperm.xlu0 %1656, %v1017_v59  }
  0x6d   : > { %1064 = vperm.xlu1 %1657, %v1018_v60  }
  0x70   : > { %1069 = vperm.xlu0 %1656, %v1019_v61  }
  0x71   : > { %1074 = vperm.xlu1 %1657, %v1020_v62  }
  0x74   : > { %1079 = vperm.xlu0 %1656, %v1021_v63  }
  0x75   : > { %1084 = vperm.xlu1 %1657, %v1022_v0  }
  0x78   : > { %1089 = vperm.xlu0 %1656, %v1023_v1  }
  0x79   : > { %1094 = vperm.xlu1 %1657, %v1024_v2  }
  0x7c   : > { %1099 = vperm.xlu0 %1656, %v1025_v3  }
  0x7d   : > { %1104 = vperm.xlu1 %1657, %v1026_v4  }
  0x80   : > { %1280 = vperm.xlu0 %1656, %v1277_v5  }
  0x9f   : > { %v429_v7 = vpop.permute.xlu0 %428  ;;  %v439_v8 = vpop.permute.xlu1 %438 }
  0xa3   : > { %v434_v9 = vpop.permute.xlu0 %433 }
  0xa4   : > { %v444_v10 = vpop.permute.xlu1 %443 }
  0xa7   : > { %v449_v11 = vpop.permute.xlu0 %448 }
  0xa8   : > { %v454_v12 = vpop.permute.xlu1 %453 }
  0xab   : > { %v459_v13 = vpop.permute.xlu0 %458 }
  0xac   : > { %v464_v17 = vpop.permute.xlu1 %463 }
  0xaf   : > { %v469_v25 = vpop.permute.xlu0 %468 }
  0xb0   : > { %v474_v29 = vpop.permute.xlu1 %473 }
  0xb3   : > { %v479_v38 = vpop.permute.xlu0 %478 }
  0xb4   : > { %v484_v42 = vpop.permute.xlu1 %483 }
  0xb7   : > { %v489_v50 = vpop.permute.xlu0 %488 }
  0xb8   : > { %v494_v55 = vpop.permute.xlu1 %493 }
  0xbb   : > { %v499_v62 = vpop.permute.xlu0 %498 }
  0xbc   : > { %v504_v3 = vpop.permute.xlu1 %503 }
 0x103   : > { %v1513_v14 = vpop.f32.mrb[0].mxu0 }
 0x104   : > { %v636_v15 = vadd.f32 %v1513_v14, %v439_v8  ;;  %v627_v16 = vpop.f32.mrb[1].mxu0 }
 0x105   : > { %v628_v18 = vadd.f32 %v627_v16, %v429_v7  ;;  %v1514_v19 = vpop.f32.mrb[2].mxu0  ;;  %v1671_v16 = vld [vmem:[%s2155_s3 + $0x10] sm:$0xff]  }
 0x106   : > { %v639_v20 = vadd.f32 %v1514_v19, %v444_v10  ;;  %v630_v21 = vpop.f32.mrb[3].mxu0  ;;  %v692_v23 = vmax.f32 %v636_v15, 0.0  ;;  %v1670_v15 = vld [vmem:[%s2155_s3 + $0x8] sm:$0xff]  }
 0x107   : > { %v631_v22 = vadd.f32 %v630_v21, %v434_v9  ;;  %v690_v26 = vmax.f32 %v628_v18, 0.0  ;;  %v1673_v18 = vld [vmem:[%s2155_s3 + $0x20] sm:$0xff]   ;;  %v1674_v19 = vld [vmem:[%s2155_s3 + $0x28] sm:$0xff]   ;;  %v1676_v21 = vld [vmem:[%s2155_s3 + $0x38] sm:$0xff]  }
 0x108   : > { %v693_v24 = vmax.f32 %v639_v20, 0.0  ;;  %v1675_v20 = vld [vmem:[%s2155_s3 + $0x30] sm:$0xff]  }
 0x109   : > { %v691_v27 = vmax.f32 %v631_v22, 0.0  ;;  %v1677_v22 = vld [vmem:[%s2157_s5] sm:$0xff]  }
 0x10a   : > { %v723_v28 = vpack.c.bf16 %v693_v24, %v692_v23  ;;  %1575 = vmatprep.mubr.bf16.mxu0 %v1677_v22  ;;  %v749_v23 = vpop.permute.xlu0 %748  ;;  %v754_v24 = vpop.permute.xlu1 %753 }
 0x10b   : > { %v1517_v30 = vpop.f32.mrb[4].mxu0  ;;  %v722_v31 = vpack.c.bf16 %v691_v27, %v690_v26 }
 0x10c   : > { %v652_v32 = vadd.f32 %v1517_v30, %v459_v13  ;;  %v643_v33 = vpop.f32.mrb[5].mxu0 }
 0x10d   : > { %v644_v34 = vadd.f32 %v643_v33, %v449_v11  ;;  %v1518_v35 = vpop.f32.mrb[6].mxu0  ;;  %1527 = vmatprep.subr.bf16.mxu1 %v722_v31 }
 0x10e   : > { %v655_v36 = vadd.f32 %v1518_v35, %v464_v17  ;;  %v646_v37 = vpop.f32.mrb[7].mxu0  ;;  %1528 = vmatpush3.bf16.msra.mxu1 %v722_v31  ;;  %v696_v40 = vmax.f32 %v652_v32, 0.0  ;;  %v1672_v17 = vld [vmem:[%s2155_s3 + $0x18] sm:$0xff]   ;;  %v764_v26 = vpop.permute.xlu1 %763 }
 0x10f   : > { %v647_v39 = vadd.f32 %v646_v37, %v454_v12  ;;  %1529 = vmatprep.subr.bf16.mxu1 %v723_v28  ;;  %v694_v43 = vmax.f32 %v644_v34, 0.0 }
 0x110   : > { %v697_v41 = vmax.f32 %v655_v36, 0.0 }
 0x111   : > { %v695_v44 = vmax.f32 %v647_v39, 0.0 }
 0x112   : > { %v725_v45 = vpack.c.bf16 %v697_v41, %v696_v40  ;;  %1530 = vmatpush3.bf16.msra.mxu1 %v723_v28  ;;  %v774_v28 = vpop.permute.xlu1 %773 }
 0x113   : > { %v724_v46 = vpack.c.bf16 %v695_v44, %v694_v43  ;;  %v1521_v47 = vpop.f32.mrb[8].mxu0 }
 0x114   : > { %v668_v48 = vadd.f32 %v1521_v47, %v479_v38  ;;  %v659_v49 = vpop.f32.mrb[9].mxu0 }
 0x115   : > { %v660_v51 = vadd.f32 %v659_v49, %v469_v25  ;;  %v1522_v52 = vpop.f32.mrb[10].mxu0  ;;  %1531 = vmatprep.subr.bf16.mxu1 %v724_v46  ;;  %v759_v25 = vpop.permute.xlu0 %758 }
 0x116   : > { %v671_v53 = vadd.f32 %v1522_v52, %v484_v42  ;;  %v662_v54 = vpop.f32.mrb[11].mxu0  ;;  %1532 = vmatpush3.bf16.msra.mxu1 %v724_v46  ;;  %v700_v57 = vmax.f32 %v668_v48, 0.0  ;;  %v784_v33 = vpop.permute.xlu1 %783 }
 0x117   : > { %v663_v56 = vadd.f32 %v662_v54, %v474_v29  ;;  %1533 = vmatprep.subr.bf16.mxu1 %v725_v45  ;;  %v698_v59 = vmax.f32 %v660_v51, 0.0 }
 0x118   : > { %v701_v58 = vmax.f32 %v671_v53, 0.0 }
 0x119   : > { %v699_v60 = vmax.f32 %v663_v56, 0.0  ;;  %v769_v27 = vpop.permute.xlu0 %768 }
 0x11a   : > { %v727_v61 = vpack.c.bf16 %v701_v58, %v700_v57  ;;  %1534 = vmatpush3.bf16.msra.mxu1 %v725_v45  ;;  %v794_v45 = vpop.permute.xlu1 %793 }
 0x11b   : > { %v726_v63 = vpack.c.bf16 %v699_v60, %v698_v59  ;;  %v1525_v0 = vpop.f32.mrb[12].mxu0 }
 0x11c   : > { %v684_v1 = vadd.f32 %v1525_v0, %v499_v62  ;;  %v675_v2 = vpop.f32.mrb[13].mxu0 }
 0x11d   : > { %v676_v4 = vadd.f32 %v675_v2, %v489_v50  ;;  %v1526_v5 = vpop.f32.mrb[14].mxu0  ;;  %1535 = vmatprep.subr.bf16.mxu1 %v726_v63  ;;  %v779_v29 = vpop.permute.xlu0 %778 }
 0x11e   : > { %v687_v6 = vadd.f32 %v1526_v5, %v504_v3  ;;  %v678_v7 = vpop.f32.mrb[15].mxu0  ;;  %1536 = vmatpush3.bf16.msra.mxu1 %v726_v63  ;;  %v704_v9 = vmax.f32 %v684_v1, 0.0  ;;  %v804_v58 = vpop.permute.xlu1 %803 }
 0x11f   : > { %v679_v8 = vadd.f32 %v678_v7, %v494_v55  ;;  %1537 = vmatprep.subr.bf16.mxu1 %v727_v61  ;;  %v702_v11 = vmax.f32 %v676_v4, 0.0 }
 0x120   : > { %v705_v10 = vmax.f32 %v687_v6, 0.0 }
 0x121   : > { %v703_v12 = vmax.f32 %v679_v8, 0.0  ;;  %v789_v41 = vpop.permute.xlu0 %788 }
 0x122   : > { %v729_v13 = vpack.c.bf16 %v705_v10, %v704_v9  ;;  %1538 = vmatpush3.bf16.msra.mxu1 %v727_v61  ;;  %v814_v7 = vpop.permute.xlu1 %813 }
 0x123   : > { %v728_v14 = vpack.c.bf16 %v703_v12, %v702_v11 }
 0x125   : > { %1539 = vmatprep.subr.bf16.mxu1 %v728_v14  ;;  %v799_v54 = vpop.permute.xlu0 %798 }
 0x126   : > { %1540 = vmatpush3.bf16.msra.mxu1 %v728_v14 }
 0x127   : > { %1541 = vmatprep.subr.bf16.mxu1 %v729_v13 }
 0x129   : > { %v809_v2 = vpop.permute.xlu0 %808 }
 0x12a   : > { %1542 = vmatpush3.bf16.msra.mxu1 %v729_v13 }
 0x12d   : > { %1544 = vmatmul.mubr.bf16.vlgmr.msra.gmra.mrb[0].mxu1 %v1670_v15  ;;  %v819_v14 = vpop.permute.xlu0 %818 }
 0x12e   : > { %1547 = vmatprep.mubr.bf16.mxu1 %v1671_v16 }
 0x135   : > { %1548 = vmatmul.mubr.bf16.gmra.mrb[4].mxu1 %v1672_v17 }
 0x136   : > { %1551 = vmatprep.mubr.bf16.mxu1 %v1673_v18 }
 0x13d   : > { %1552 = vmatmul.mubr.bf16.gmra.mrb[8].mxu1 %v1674_v19  ;;  %v824_v19 = vpop.permute.xlu1 %823 }
 0x13e   : > { %1555 = vmatprep.mubr.bf16.mxu1 %v1675_v20 }
 0x145   : > { %1556 = vmatmul.mubr.bf16.gmra.mrb[12].mxu1 %v1676_v21 }
 0x200   : > { %v1545_v30 = vpop.f32.mrb[0].mxu1 }
 0x201   : > { %v917_v31 = vadd.f32 %v1545_v30, %v759_v25  ;;  %v908_v32 = vpop.f32.mrb[1].mxu1 }
 0x202   : > { %v909_v34 = vadd.f32 %v908_v32, %v749_v23  ;;  %v1546_v35 = vpop.f32.mrb[2].mxu1  ;;  %v1679_v32 = vld [vmem:[%s2157_s5 + $0x10] sm:$0xff]  }
 0x203   : > { %v920_v36 = vadd.f32 %v1546_v35, %v764_v26  ;;  %v911_v37 = vpop.f32.mrb[3].mxu1  ;;  %v973_v39 = vmax.f32 %v917_v31, 0.0  ;;  %v1678_v31 = vld [vmem:[%s2157_s5 + $0x8] sm:$0xff]  }
 0x204   : > { %v912_v38 = vadd.f32 %v911_v37, %v754_v24  ;;  %v971_v42 = vmax.f32 %v909_v34, 0.0  ;;  %v1681_v34 = vld [vmem:[%s2157_s5 + $0x20] sm:$0xff]   ;;  %v1682_v35 = vld [vmem:[%s2157_s5 + $0x28] sm:$0xff]   ;;  %v1684_v37 = vld [vmem:[%s2157_s5 + $0x38] sm:$0xff]  }
 0x205   : > { %v974_v40 = vmax.f32 %v920_v36, 0.0  ;;  %v1683_v36 = vld [vmem:[%s2157_s5 + $0x30] sm:$0xff]  }
 0x206   : > { %v972_v43 = vmax.f32 %v912_v38, 0.0  ;;  %v1753_v38 = vmov 0.0  }
 0x207   : > { %v1004_v44 = vpack.c.bf16 %v974_v40, %v973_v39  ;;  %1591 = vmatprep.subr.bf16.mxu1 %v1753_v38  ;;  %1607 = vmatprep.mubr.msk.bf16.mxu1 %vm1754_vm3, %v1753_v38  ;;  %v1030_v39 = vpop.permute.xlu0 %1029  ;;  %v1035_v40 = vpop.permute.xlu1 %1034 }
 0x208   : > { %v1003_v46 = vpack.c.bf16 %v972_v43, %v971_v42  ;;  %v1549_v47 = vpop.f32.mrb[4].mxu1 }
 0x209   : > { %v933_v48 = vadd.f32 %v1549_v47, %v779_v29  ;;  %v924_v49 = vpop.f32.mrb[5].mxu1 }
 0x20a   : > { %v925_v50 = vadd.f32 %v924_v49, %v769_v27  ;;  %v1550_v51 = vpop.f32.mrb[6].mxu1  ;;  %1559 = vmatprep.subr.bf16.mxu0 %v1003_v46 }
 0x20b   : > { %v936_v52 = vadd.f32 %v1550_v51, %v784_v33  ;;  %v927_v53 = vpop.f32.mrb[7].mxu1  ;;  %1560 = vmatpush3.bf16.msra.mxu0 %v1003_v46  ;;  %v977_v56 = vmax.f32 %v933_v48, 0.0  ;;  %v1680_v33 = vld [vmem:[%s2157_s5 + $0x18] sm:$0xff]   ;;  %v1045_v42 = vpop.permute.xlu1 %1044 }
 0x20c   : > { %v928_v55 = vadd.f32 %v927_v53, %v774_v28  ;;  %1561 = vmatprep.subr.bf16.mxu0 %v1004_v44  ;;  %v975_v59 = vmax.f32 %v925_v50, 0.0 }
 0x20d   : > { %v978_v57 = vmax.f32 %v936_v52, 0.0 }
 0x20e   : > { %v976_v60 = vmax.f32 %v928_v55, 0.0 }
 0x20f   : > { %v1006_v61 = vpack.c.bf16 %v978_v57, %v977_v56  ;;  %1562 = vmatpush3.bf16.msra.mxu0 %v1004_v44  ;;  %v1055_v44 = vpop.permute.xlu1 %1054 }
 0x210   : > { %v1005_v62 = vpack.c.bf16 %v976_v60, %v975_v59  ;;  %v1553_v63 = vpop.f32.mrb[8].mxu1 }
 0x211   : > { %v949_v0 = vadd.f32 %v1553_v63, %v799_v54  ;;  %v940_v1 = vpop.f32.mrb[9].mxu1 }
 0x212   : > { %v941_v3 = vadd.f32 %v940_v1, %v789_v41  ;;  %v1554_v4 = vpop.f32.mrb[10].mxu1  ;;  %1563 = vmatprep.subr.bf16.mxu0 %v1005_v62  ;;  %v1040_v41 = vpop.permute.xlu0 %1039 }
 0x213   : > { %v952_v5 = vadd.f32 %v1554_v4, %v804_v58  ;;  %v943_v6 = vpop.f32.mrb[11].mxu1  ;;  %1564 = vmatpush3.bf16.msra.mxu0 %v1005_v62  ;;  %v981_v9 = vmax.f32 %v949_v0, 0.0  ;;  %v1065_v49 = vpop.permute.xlu1 %1064 }
 0x214   : > { %v944_v8 = vadd.f32 %v943_v6, %v794_v45  ;;  %1565 = vmatprep.subr.bf16.mxu0 %v1006_v61  ;;  %v979_v11 = vmax.f32 %v941_v3, 0.0 }
 0x215   : > { %v982_v10 = vmax.f32 %v952_v5, 0.0 }
 0x216   : > { %v980_v12 = vmax.f32 %v944_v8, 0.0  ;;  %v1050_v43 = vpop.permute.xlu0 %1049 }
 0x217   : > { %v1008_v13 = vpack.c.bf16 %v982_v10, %v981_v9  ;;  %1566 = vmatpush3.bf16.msra.mxu0 %v1006_v61  ;;  %v1075_v61 = vpop.permute.xlu1 %1074 }
 0x218   : > { %v1007_v15 = vpack.c.bf16 %v980_v12, %v979_v11  ;;  %v1557_v16 = vpop.f32.mrb[12].mxu1 }
 0x219   : > { %v965_v17 = vadd.f32 %v1557_v16, %v819_v14  ;;  %v956_v18 = vpop.f32.mrb[13].mxu1 }
 0x21a   : > { %v957_v20 = vadd.f32 %v956_v18, %v809_v2  ;;  %v1558_v21 = vpop.f32.mrb[14].mxu1  ;;  %1567 = vmatprep.subr.bf16.mxu0 %v1007_v15  ;;  %v1060_v45 = vpop.permute.xlu0 %1059 }
 0x21b   : > { %v968_v22 = vadd.f32 %v1558_v21, %v824_v19  ;;  %v959_v23 = vpop.f32.mrb[15].mxu1  ;;  %1568 = vmatpush3.bf16.msra.mxu0 %v1007_v15  ;;  %v985_v25 = vmax.f32 %v965_v17, 0.0  ;;  %v1085_v10 = vpop.permute.xlu1 %1084 }
 0x21c   : > { %v960_v24 = vadd.f32 %v959_v23, %v814_v7  ;;  %1569 = vmatprep.subr.bf16.mxu0 %v1008_v13  ;;  %v983_v27 = vmax.f32 %v957_v20, 0.0 }
 0x21d   : > { %v986_v26 = vmax.f32 %v968_v22, 0.0 }
 0x21e   : > { %v984_v28 = vmax.f32 %v960_v24, 0.0  ;;  %v1070_v57 = vpop.permute.xlu0 %1069 }
 0x21f   : > { %v1010_v29 = vpack.c.bf16 %v986_v26, %v985_v25  ;;  %1570 = vmatpush3.bf16.msra.mxu0 %v1008_v13  ;;  %v1095_v23 = vpop.permute.xlu1 %1094 }
 0x220   : > { %v1009_v30 = vpack.c.bf16 %v984_v28, %v983_v27 }
 0x222   : > { %1571 = vmatprep.subr.bf16.mxu0 %v1009_v30  ;;  %v1080_v6 = vpop.permute.xlu0 %1079 }
 0x223   : > { %1572 = vmatpush3.bf16.msra.mxu0 %v1009_v30 }
 0x224   : > { %1573 = vmatprep.subr.bf16.mxu0 %v1010_v29 }
 0x226   : > { %v1090_v18 = vpop.permute.xlu0 %1089 }
 0x227   : > { %1574 = vmatpush3.bf16.msra.mxu0 %v1010_v29 }
 0x22a   : > { %1576 = vmatmul.mubr.bf16.vlgmr.msra.gmra.mrb[16].mxu0 %v1678_v31  ;;  %v1100_v30 = vpop.permute.xlu0 %1099 }
 0x22b   : > { %1579 = vmatprep.mubr.bf16.mxu0 %v1679_v32 }
 0x232   : > { %1580 = vmatmul.mubr.bf16.gmra.mrb[20].mxu0 %v1680_v33 }
 0x233   : > { %1583 = vmatprep.mubr.bf16.mxu0 %v1681_v34 }
 0x23a   : > { %1584 = vmatmul.mubr.bf16.gmra.mrb[24].mxu0 %v1682_v35  ;;  %v1105_v35 = vpop.permute.xlu1 %1104 }
 0x23b   : > { %1587 = vmatprep.mubr.bf16.mxu0 %v1683_v36 }
 0x242   : > { %1588 = vmatmul.mubr.bf16.gmra.mrb[28].mxu0 %v1684_v37 }
 0x2fd   : > { %v1577_v46 = vpop.f32.mrb[16].mxu0 }
 0x2fe   : > { %v1198_v47 = vadd.f32 %v1577_v46, %v1040_v41  ;;  %v1189_v48 = vpop.f32.mrb[17].mxu0 }
 0x2ff   : > { %v1190_v50 = vadd.f32 %v1189_v48, %v1030_v39  ;;  %v1578_v51 = vpop.f32.mrb[18].mxu0  ;;  %v1268_v48 = vld [vmem:[%s2159_s7] sm:$0xf] }
 0x300   : > { %v1201_v52 = vadd.f32 %v1578_v51, %v1045_v42  ;;  %v1192_v53 = vpop.f32.mrb[19].mxu0  ;;  %v1254_v55 = vmax.f32 %v1198_v47, 0.0 }
 0x301   : > { %v1193_v54 = vadd.f32 %v1192_v53, %v1035_v40  ;;  %v1252_v58 = vmax.f32 %v1190_v50, 0.0 }
 0x302   : > { %v1255_v56 = vmax.f32 %v1201_v52, 0.0 }
 0x303   : > { %v1253_v59 = vmax.f32 %v1193_v54, 0.0 }
 0x304   : > { %v1270_v60 = vpack.c.bf16 %v1255_v56, %v1254_v55  ;;  %v1323_v55 = vlaneseq }
 0x305   : > { %v1269_v62 = vpack.c.bf16 %v1253_v59, %v1252_v58  ;;  %v1581_v63 = vpop.f32.mrb[20].mxu0 }
 0x306   : > { %v1214_v0 = vadd.f32 %v1581_v63, %v1060_v45  ;;  %v1205_v1 = vpop.f32.mrb[21].mxu0  ;;  %v1324_v56 = vshrl.u32 %v1323_v55, 7 }
 0x307   : > { %v1206_v2 = vadd.f32 %v1205_v1, %v1050_v43  ;;  %v1582_v3 = vpop.f32.mrb[22].mxu0  ;;  %1592 = vmatpush3.bf16.msra.mxu1 %v1269_v62 }
 0x308   : > { %v1217_v4 = vadd.f32 %v1582_v3, %v1065_v49  ;;  %v1208_v5 = vpop.f32.mrb[23].mxu0  ;;  %1593 = vmatprep.subr.bf16.mxu1 %v1753_v38  ;;  %v1258_v8 = vmax.f32 %v1214_v0, 0.0  ;;  %v1281_v49 = vpop.permute.xlu0 %1280  ;;  %vm1325_vm4 = vcmp.eq.s32.totalorder %v1324_v56, 0 }
 0x309   : > { %v1209_v7 = vadd.f32 %v1208_v5, %v1055_v44  ;;  %v1256_v11 = vmax.f32 %v1206_v2, 0.0 }
 0x30a   : > { %v1259_v9 = vmax.f32 %v1217_v4, 0.0 }
 0x30b   : > { %v1257_v12 = vmax.f32 %v1209_v7, 0.0  ;;  %1594 = vmatpush3.bf16.msra.mxu1 %v1270_v60 }
 0x30c   : > { %v1272_v13 = vpack.c.bf16 %v1259_v9, %v1258_v8  ;;  %1595 = vmatprep.subr.bf16.mxu1 %v1753_v38 }
 0x30d   : > { %v1271_v14 = vpack.c.bf16 %v1257_v12, %v1256_v11  ;;  %v1585_v15 = vpop.f32.mrb[24].mxu0 }
 0x30e   : > { %v1230_v16 = vadd.f32 %v1585_v15, %v1080_v6  ;;  %v1221_v17 = vpop.f32.mrb[25].mxu0 }
 0x30f   : > { %v1222_v19 = vadd.f32 %v1221_v17, %v1070_v57  ;;  %v1586_v20 = vpop.f32.mrb[26].mxu0  ;;  %1596 = vmatpush3.bf16.msra.mxu1 %v1271_v14 }
 0x310   : > { %v1233_v21 = vadd.f32 %v1586_v20, %v1085_v10  ;;  %v1224_v22 = vpop.f32.mrb[27].mxu0  ;;  %1597 = vmatprep.subr.bf16.mxu1 %v1753_v38  ;;  %v1262_v25 = vmax.f32 %v1230_v16, 0.0 }
 0x311   : > { %v1225_v24 = vadd.f32 %v1224_v22, %v1075_v61  ;;  %v1260_v27 = vmax.f32 %v1222_v19, 0.0 }
 0x312   : > { %v1263_v26 = vmax.f32 %v1233_v21, 0.0 }
 0x313   : > { %v1261_v28 = vmax.f32 %v1225_v24, 0.0  ;;  %1598 = vmatpush3.bf16.msra.mxu1 %v1272_v13 }
 0x314   : > { %v1274_v29 = vpack.c.bf16 %v1263_v26, %v1262_v25  ;;  %1599 = vmatprep.subr.bf16.mxu1 %v1753_v38 }
 0x315   : > { %v1273_v31 = vpack.c.bf16 %v1261_v28, %v1260_v27  ;;  %v1589_v32 = vpop.f32.mrb[28].mxu0 }
 0x316   : > { %v1246_v33 = vadd.f32 %v1589_v32, %v1100_v30  ;;  %v1237_v34 = vpop.f32.mrb[29].mxu0 }
 0x317   : > { %v1238_v36 = vadd.f32 %v1237_v34, %v1090_v18  ;;  %v1590_v37 = vpop.f32.mrb[30].mxu0  ;;  %1600 = vmatpush3.bf16.msra.mxu1 %v1273_v31 }
 0x318   : > { %v1249_v39 = vadd.f32 %v1590_v37, %v1105_v35  ;;  %v1240_v40 = vpop.f32.mrb[31].mxu0  ;;  %1601 = vmatprep.subr.bf16.mxu1 %v1753_v38  ;;  %v1266_v42 = vmax.f32 %v1246_v33, 0.0 }
 0x319   : > { %v1241_v41 = vadd.f32 %v1240_v40, %v1095_v23  ;;  %v1264_v44 = vmax.f32 %v1238_v36, 0.0 }
 0x31a   : > { %v1267_v43 = vmax.f32 %v1249_v39, 0.0 }
 0x31b   : > { %v1265_v45 = vmax.f32 %v1241_v41, 0.0  ;;  %1602 = vmatpush3.bf16.msra.mxu1 %v1274_v29 }
 0x31c   : > { %v1276_v46 = vpack.c.bf16 %v1267_v43, %v1266_v42  ;;  %1603 = vmatprep.subr.bf16.mxu1 %v1753_v38 }
 0x31d   : > { %v1275_v47 = vpack.c.bf16 %v1265_v45, %v1264_v44 }
 0x31f   : > { %1604 = vmatpush3.bf16.msra.mxu1 %v1275_v47 }
 0x320   : > { %1605 = vmatprep.subr.bf16.mxu1 %v1753_v38 }
 0x323   : > { %1606 = vmatpush3.bf16.msra.mxu1 %v1276_v46 }
 0x326   : > { %1608 = vmatmul.mubr.bf16.vlgmr.msra.gmra.mrb[16].mxu1 %v1268_v48 }
 0x3f9   : > { %v1317_v50 = vpop.f32.mrb[16].mxu1 }
 0x3fa   : > { %v1318_v51 = vadd.f32 %v1317_v50, %v1281_v49  ;;  %v1609_v52 = vpop.f32.mrb[17].mxu1 }
 0x3fb   : > { %v1320_v53 = vpop.f32.mrb[18].mxu1 }
 0x3fc   : > { %1685 = vtanh.f32 %v1318_v51  ;;  %v1610_v54 = vpop.f32.mrb[19].mxu1 }
 0x406   : > { %v1686_v38 = vpop.eup %1685 }
 0x407   : > { %v1327_v57 = vsel %vm1325_vm4, %v1686_v38, %v1318_v51 }
 0x408   : > { %1328 = vst [vmem:[%s387_s26] sm:$0xff] %v1327_v57 }
 0x409   : > { %1700 = shalt.err (!%p1697_p5)
}
 0x40a   : > { %s1701_s14 = scalar_lea.hbm %s2109_s16, 128  ;;  %s1705_s26 = scalar_lea.hbm %s2161_s9, 384 }
 0x40b   : > { %p1702_p7 = scmp.ne.s32.totalorder %s2109_s16, %s1701_s14  ;;  %p1706_p11 = scmp.lt.u32.totalorder %s2109_s16, %s2161_s9 }
 0x40c   : > { %p1707_p12 = scmp.lt.u32.totalorder %s1705_s26, %s1701_s14  ;;  %p1709_p0 = scmp.lt.u32.totalorder %s1701_s14, %s2109_s16 }
 0x40d   : > { %p1703_p9 = pnand %p1702_p7, %p1844_p6 }
 0x40e   : > { %p1708_p13 = por %p1707_p12, %p1706_p11 }
 0x40f   : > { %p1704_p10 = pneg %p1703_p9 }
 0x410   : > { %p1710_p1 = por %p1709_p0, %p1708_p13 }
 0x412   : > { %p1711_p2 = pnand %p1710_p1, %p1704_p10 }
 0x414   : > { %1714 = shalt.err (!%p1711_p2)
}
 0x415   : > { %1613 = dma.vmem_to_hbm [thread:$0]  (%p1844_p6), %s2111_s27, 128, %s2109_s16, %s1330_s17  }
 0x416 PF: > { %p1619_p3 = scmp.ge.s32.totalorder %s1749_s12, 2  ;;  %s1355_s22 = sand.u32 1, %s1737_s30  }
 0x417   : > { %s1356_s13 = scalar_lea.sflag [#allocation4], %s1355_s22 }
 0x418   : > { %p1616_p4 = pnand %p1619_p3, %p1848_p8 }
 0x41a   : > { %1732 = dma.done.wait (!%p1616_p4), %s1356_s13, 128  }
 0x41b   : > { %1734 = vsyncadd (!%p1616_p4), %s1356_s13, 4294967168  ;;  %p19_p5 = scmp.ge.s32.totalorder %s1829_s15, 5   ;;  %s2164_s30 = smov %s1741_s10 }
 0x41c   : > { %s2165_s10 = smov %s1745_s11  ;;  %s2166_s11 = smov %s1842_s18 }
 0x41d   : > { %s2167_s12 = smov %s1829_s15  ;;  %21 = sbr.rel (!%p19_p5) target bundleno = 3 (0x3), region = 137 }
 0x424   :  { %1361 = vsyncpa [#allocation4], 1 }
 0x425   :  { %1363 = vsyncpa [#allocation4 + $0x1], 1 }

</bundles_post_ra>
